<compile_context>
chip_gen: v5e
topology: v5e:2x2
jax: 0.10.0
libtpu: 0.0.40
codegen_flags: <defaults>
</compile_context>

<pallas_src>
import functools

import jax
import jax.numpy as jnp
from jax.experimental import pallas as pl
from jax.experimental.pallas import tpu as pltpu


def _round_up(x, m):
    return ((x + m - 1) // m) * m


def _pose_cost_kernel(params_ref, pos_ref, rot_ref, out_ref,
                      *, w0, w1, hinge_val, conv0, conv1):
    # params layout (SMEM, f32[18]):
    #   [0:9]   Rg row-major: Rg[r, c] = params[3*r + c]
    #   [9:12]  t   = -(Rg^T @ goal_pos)
    #   [12:15] pw  (position weights, vec_weight[3:6])
    #   [15:18] rw  (rotation weights, vec_weight[0:3])
    Rg = [[params_ref[3 * r + c] for c in range(3)] for r in range(3)]
    t = [params_ref[9 + k] for k in range(3)]
    pw = [params_ref[12 + k] for k in range(3)]
    rw = [params_ref[15 + k] for k in range(3)]

    # lane-dense component planes, each (1, TILE)
    p = [pos_ref[k:k + 1, :] for k in range(3)]
    R = [[rot_ref[3 * k + j:3 * k + j + 1, :] for j in range(3)]
         for k in range(3)]

    # ---- position path: d_i = sum_j Rg[j,i] * p_j + t_i  (== Rg^T p - Rg^T gp)
    pos_err = None
    for i in range(3):
        d_i = Rg[0][i] * p[0] + Rg[1][i] * p[1] + Rg[2][i] * p[2] + t[i]
        wd = pw[i] * d_i
        sq = wd * wd
        pos_err = sq if pos_err is None else pos_err + sq
    goal_dist = jnp.sqrt(pos_err)                      # (1, TILE)

    # ---- rotation path: (Rg^T R)[i,j] = sum_k Rg[k,i] * R[k,j]
    rot_sum = None
    for i in range(3):
        row_sq = None
        for j in range(3):
            g_ij = (Rg[0][i] * R[0][j] + Rg[1][i] * R[1][j]
                    + Rg[2][i] * R[2][j])
            e = (1.0 if i == j else 0.0) - g_ij        # I - Rg^T R
            sq = e * e
            row_sq = sq if row_sq is None else row_sq + sq
        row_norm = jnp.sqrt(row_sq)                    # row-wise L2 norm
        term = rw[i] * row_norm
        rot_sum = term if rot_sum is None else rot_sum + term
    rot_sq = rot_sum * rot_sum                         # pre-hinge rot_err

    zero = jnp.zeros_like(rot_sq)

    # ---- hinge + convergence masks; sqrt-free exact cost:
    #   sqrt(rot_err)      == |rot_sum|  where kept, else 0
    #   sqrt(position_err) == goal_dist  where kept, else 0
    if hinge_val > 0.0:
        hinge_ok = goal_dist <= hinge_val
        rot_err = jnp.where(hinge_ok, rot_sq, zero)
        keep_rot = jnp.logical_and(hinge_ok, rot_err >= conv0)
    else:
        keep_rot = rot_sq >= conv0
    sqrt_rot = jnp.where(keep_rot, jnp.abs(rot_sum), zero)
    sqrt_pos = jnp.where(pos_err >= conv1, goal_dist, zero)

    # GaussianProjection with empty gaussian_params is identity.
    # TODO(synk): implement non-empty gaussian_params (n_p/c/s/r) projection if needed.
    cost = w0 * sqrt_rot + w1 * sqrt_pos               # (1, TILE)

    out_ref[0:1, :] = cost
    out_ref[1:2, :] = goal_dist
    out_ref[2:3, :] = rot_sq


def pose_cost_forward(ee_pos_batch, ee_rot_batch, ee_goal_pos, ee_goal_rot,
                      weight, vec_weight, hinge_val=100.0,
                      convergence_val=(0.0, 0.0), tile=8192):
    f32 = jnp.float32
    B, H, _ = ee_pos_batch.shape
    N = B * H

    # ---- glue: SoA transpose (N on the lane axis) + goal-constant packing
    pos = ee_pos_batch.reshape(N, 3).astype(f32).T          # [3, N]
    rot = ee_rot_batch.reshape(N, 9).astype(f32).T          # [9, N], row 3i+j = R[:,i,j]
    Rg = ee_goal_rot.reshape(3, 3).astype(f32)
    gp = ee_goal_pos.reshape(3).astype(f32)
    t = -(Rg.T @ gp)                                         # [3]
    vw = jnp.asarray(vec_weight, f32)
    params = jnp.concatenate([Rg.reshape(9), t, vw[3:6], vw[0:3]])  # [18]

    # ---- pad N to a lane-aligned tile multiple
    n_pad = _round_up(max(N, 1), 128)
    tile = _round_up(min(tile, n_pad), 128)
    n_pad = _round_up(n_pad, tile)
    pos_p = jnp.pad(pos, ((0, 0), (0, n_pad - N)))
    rot_p = jnp.pad(rot, ((0, 0), (0, n_pad - N)))

    kernel = functools.partial(
        _pose_cost_kernel,
        w0=float(weight[0]), w1=float(weight[1]),
        hinge_val=float(hinge_val),
        conv0=float(convergence_val[0]), conv1=float(convergence_val[1]))

    out = pl.pallas_call(
        kernel,
        grid=(n_pad // tile,),
        in_specs=[
            pl.BlockSpec(memory_space=pltpu.MemorySpace.SMEM),   # params [18]
            pl.BlockSpec((3, tile), lambda i: (0, i)),           # pos [3, N]
            pl.BlockSpec((9, tile), lambda i: (0, i)),           # rot [9, N]
        ],
        out_specs=pl.BlockSpec((3, tile), lambda i: (0, i)),
        out_shape=jax.ShapeDtypeStruct((3, n_pad), f32),
        compiler_params=pltpu.CompilerParams(
            dimension_semantics=("parallel",),
            vmem_limit_bytes=32 * 1024 * 1024),
    )(params, pos_p, rot_p)

    cost = out[0, :N].reshape(B, H)
    goal_dist = out[1, :N].reshape(B, H, 1)
    rot_sq = out[2, :N].reshape(B, H)
    # rot_err_norm = ||sum_i rw_i * row_norm_i||_2 over horizon, per batch.
    rot_err_norm = jnp.sqrt(jnp.sum(rot_sq, axis=1, keepdims=True))
    return cost, rot_err_norm, goal_dist


def _ref_forward(ee_pos, ee_rot, gp, gr, weight, vec_weight, hinge_val, conv):
    """Pure-JAX mirror of the PyTorch forward (for correctness checking)."""
    f32 = jnp.float32
    vw = jnp.asarray(vec_weight, f32)
    rw, pw = vw[0:3], vw[3:6]
    with jax.default_matmul_precision("highest"):
        R_g_t = jnp.swapaxes(gr, -2, -1)                               # [1,3,3]
        R_g_t_d = jnp.swapaxes(-1.0 * (R_g_t @ gp.T), -2, -1)          # [1,1,3]
        R_g_ee = R_g_t @ ee_rot                                        # [B,H,3,3]
        term1 = jnp.swapaxes(R_g_t @ jnp.swapaxes(ee_pos, -2, -1), -2, -1)
    d = term1 + R_g_t_d
    goal_dist = jnp.linalg.norm(pw * d, axis=-1, keepdims=True)
    position_err = jnp.sum(jnp.square(pw * d), axis=-1)
    rot_err = jnp.eye(3, dtype=f32) - R_g_ee
    rot_err = jnp.linalg.norm(rot_err, axis=-1)
    s = jnp.sum(rw * rot_err, axis=-1)
    rot_err_norm = jnp.linalg.norm(s, axis=-1, keepdims=True)
    rot_err = jnp.square(s)
    if hinge_val > 0.0:
        rot_err = jnp.where(goal_dist[..., 0] <= hinge_val, rot_err, 0.0)
    rot_err = jnp.where(rot_err < conv[0], 0.0, rot_err)
    position_err = jnp.where(position_err < conv[1], 0.0, position_err)
    cost = weight[0] * jnp.sqrt(rot_err) + weight[1] * jnp.sqrt(position_err)
    return cost, rot_err_norm, goal_dist


if __name__ == "__main__":
    key = jax.random.PRNGKey(0)
    B, H = 2, 8
    k1, k2, k3, k4 = jax.random.split(key, 4)

    ee_pos_batch = jax.random.normal(k1, (B, H, 3), dtype=jnp.float32)
    ee_rot_batch = jax.random.normal(k2, (B, H, 3, 3), dtype=jnp.float32)
    ee_goal_pos = jax.random.normal(k3, (1, 3), dtype=jnp.float32)
    q, _ = jnp.linalg.qr(jax.random.normal(k4, (3, 3), dtype=jnp.float32))
    ee_goal_rot = q.reshape(1, 3, 3).astype(jnp.float32)

    weight = [1.0, 10.0]
    vec_weight = [1.0, 1.0, 1.0, 2.0, 2.0, 2.0]
    hinge_val = 100.0
    convergence_val = (0.0, 0.0)

    cost, rot_err_norm, goal_dist = pose_cost_forward(
        ee_pos_batch, ee_rot_batch, ee_goal_pos, ee_goal_rot,
        weight, vec_weight, hinge_val, convergence_val)
    jax.block_until_ready((cost, rot_err_norm, goal_dist))

    ref_cost, ref_norm, ref_gd = _ref_forward(
        ee_pos_batch, ee_rot_batch, ee_goal_pos, ee_goal_rot,
        weight, vec_weight, hinge_val, convergence_val)

    assert cost.shape == (B, H)
    assert rot_err_norm.shape == (B, 1)
    assert goal_dist.shape == (B, H, 1)
    assert jnp.allclose(cost, ref_cost, atol=5e-3, rtol=5e-3)
    assert jnp.allclose(rot_err_norm, ref_norm, atol=5e-3, rtol=5e-3)
    assert jnp.allclose(goal_dist, ref_gd, atol=5e-3, rtol=5e-3)

    print("KERNEL_OK")
</pallas_src>

<mosaic_0001>
module attributes {stable_mosaic.version = 11 : i64} {
  func.func @_pose_cost_kernel(%arg0: i32, %arg1: memref<18xf32, #tpu.memory_space<smem>>, %arg2: memref<3x128xf32, #tpu.memory_space<vmem>>, %arg3: memref<9x128xf32, #tpu.memory_space<vmem>>, %arg4: memref<3x128xf32, #tpu.memory_space<vmem>>) attributes {dimension_semantics = [#tpu.dimension_semantics<parallel>], iteration_bounds = array<i64: 1>, scalar_prefetch = 0 : i64, scratch_operands = 0 : i64, tpu.core_type = #tpu.core_type<tc>, window_params = [{transform_indices = @transform_0, window_bounds = array<i64: 18>}, {transform_indices = @transform_1, window_bounds = array<i64: 3, 128>}, {transform_indices = @transform_2, window_bounds = array<i64: 9, 128>}, {transform_indices = @transform_3, window_bounds = array<i64: 3, 128>}]} {
    %c0 = arith.constant 0 : index
    %0 = memref.load %arg1[%c0] : memref<18xf32, #tpu.memory_space<smem>>
    %c1 = arith.constant 1 : index
    %1 = memref.load %arg1[%c1] : memref<18xf32, #tpu.memory_space<smem>>
    %c2 = arith.constant 2 : index
    %2 = memref.load %arg1[%c2] : memref<18xf32, #tpu.memory_space<smem>>
    %c3 = arith.constant 3 : index
    %3 = memref.load %arg1[%c3] : memref<18xf32, #tpu.memory_space<smem>>
    %c4 = arith.constant 4 : index
    %4 = memref.load %arg1[%c4] : memref<18xf32, #tpu.memory_space<smem>>
    %c5 = arith.constant 5 : index
    %5 = memref.load %arg1[%c5] : memref<18xf32, #tpu.memory_space<smem>>
    %c6 = arith.constant 6 : index
    %6 = memref.load %arg1[%c6] : memref<18xf32, #tpu.memory_space<smem>>
    %c7 = arith.constant 7 : index
    %7 = memref.load %arg1[%c7] : memref<18xf32, #tpu.memory_space<smem>>
    %c8 = arith.constant 8 : index
    %8 = memref.load %arg1[%c8] : memref<18xf32, #tpu.memory_space<smem>>
    %c9 = arith.constant 9 : index
    %9 = memref.load %arg1[%c9] : memref<18xf32, #tpu.memory_space<smem>>
    %c10 = arith.constant 10 : index
    %10 = memref.load %arg1[%c10] : memref<18xf32, #tpu.memory_space<smem>>
    %c11 = arith.constant 11 : index
    %11 = memref.load %arg1[%c11] : memref<18xf32, #tpu.memory_space<smem>>
    %c12 = arith.constant 12 : index
    %12 = memref.load %arg1[%c12] : memref<18xf32, #tpu.memory_space<smem>>
    %c13 = arith.constant 13 : index
    %13 = memref.load %arg1[%c13] : memref<18xf32, #tpu.memory_space<smem>>
    %c14 = arith.constant 14 : index
    %14 = memref.load %arg1[%c14] : memref<18xf32, #tpu.memory_space<smem>>
    %c15 = arith.constant 15 : index
    %15 = memref.load %arg1[%c15] : memref<18xf32, #tpu.memory_space<smem>>
    %c16 = arith.constant 16 : index
    %16 = memref.load %arg1[%c16] : memref<18xf32, #tpu.memory_space<smem>>
    %c17 = arith.constant 17 : index
    %17 = memref.load %arg1[%c17] : memref<18xf32, #tpu.memory_space<smem>>
    %c0_0 = arith.constant 0 : index
    %c0_1 = arith.constant 0 : index
    %18 = vector.load %arg2[%c0_0, %c0_1] : memref<3x128xf32, #tpu.memory_space<vmem>>, vector<1x128xf32>
    %c1_2 = arith.constant 1 : index
    %c0_3 = arith.constant 0 : index
    %19 = vector.load %arg2[%c1_2, %c0_3] : memref<3x128xf32, #tpu.memory_space<vmem>>, vector<1x128xf32>
    %c2_4 = arith.constant 2 : index
    %c0_5 = arith.constant 0 : index
    %20 = vector.load %arg2[%c2_4, %c0_5] : memref<3x128xf32, #tpu.memory_space<vmem>>, vector<1x128xf32>
    %c0_6 = arith.constant 0 : index
    %c0_7 = arith.constant 0 : index
    %21 = vector.load %arg3[%c0_6, %c0_7] : memref<9x128xf32, #tpu.memory_space<vmem>>, vector<1x128xf32>
    %c1_8 = arith.constant 1 : index
    %c0_9 = arith.constant 0 : index
    %22 = vector.load %arg3[%c1_8, %c0_9] : memref<9x128xf32, #tpu.memory_space<vmem>>, vector<1x128xf32>
    %c2_10 = arith.constant 2 : index
    %c0_11 = arith.constant 0 : index
    %23 = vector.load %arg3[%c2_10, %c0_11] : memref<9x128xf32, #tpu.memory_space<vmem>>, vector<1x128xf32>
    %c3_12 = arith.constant 3 : index
    %c0_13 = arith.constant 0 : index
    %24 = vector.load %arg3[%c3_12, %c0_13] : memref<9x128xf32, #tpu.memory_space<vmem>>, vector<1x128xf32>
    %c4_14 = arith.constant 4 : index
    %c0_15 = arith.constant 0 : index
    %25 = vector.load %arg3[%c4_14, %c0_15] : memref<9x128xf32, #tpu.memory_space<vmem>>, vector<1x128xf32>
    %c5_16 = arith.constant 5 : index
    %c0_17 = arith.constant 0 : index
    %26 = vector.load %arg3[%c5_16, %c0_17] : memref<9x128xf32, #tpu.memory_space<vmem>>, vector<1x128xf32>
    %c6_18 = arith.constant 6 : index
    %c0_19 = arith.constant 0 : index
    %27 = vector.load %arg3[%c6_18, %c0_19] : memref<9x128xf32, #tpu.memory_space<vmem>>, vector<1x128xf32>
    %c7_20 = arith.constant 7 : index
    %c0_21 = arith.constant 0 : index
    %28 = vector.load %arg3[%c7_20, %c0_21] : memref<9x128xf32, #tpu.memory_space<vmem>>, vector<1x128xf32>
    %c8_22 = arith.constant 8 : index
    %c0_23 = arith.constant 0 : index
    %29 = vector.load %arg3[%c8_22, %c0_23] : memref<9x128xf32, #tpu.memory_space<vmem>>, vector<1x128xf32>
    %30 = vector.broadcast %0 : f32 to vector<1x128xf32>
    %31 = arith.mulf %30, %18 : vector<1x128xf32>
    %32 = vector.broadcast %3 : f32 to vector<1x128xf32>
    %33 = arith.mulf %32, %19 : vector<1x128xf32>
    %34 = arith.addf %31, %33 : vector<1x128xf32>
    %35 = vector.broadcast %6 : f32 to vector<1x128xf32>
    %36 = arith.mulf %35, %20 : vector<1x128xf32>
    %37 = arith.addf %34, %36 : vector<1x128xf32>
    %38 = vector.broadcast %9 : f32 to vector<1x128xf32>
    %39 = arith.addf %37, %38 : vector<1x128xf32>
    %40 = vector.broadcast %12 : f32 to vector<1x128xf32>
    %41 = arith.mulf %40, %39 : vector<1x128xf32>
    %42 = arith.mulf %41, %41 : vector<1x128xf32>
    %43 = vector.broadcast %1 : f32 to vector<1x128xf32>
    %44 = arith.mulf %43, %18 : vector<1x128xf32>
    %45 = vector.broadcast %4 : f32 to vector<1x128xf32>
    %46 = arith.mulf %45, %19 : vector<1x128xf32>
    %47 = arith.addf %44, %46 : vector<1x128xf32>
    %48 = vector.broadcast %7 : f32 to vector<1x128xf32>
    %49 = arith.mulf %48, %20 : vector<1x128xf32>
    %50 = arith.addf %47, %49 : vector<1x128xf32>
    %51 = vector.broadcast %10 : f32 to vector<1x128xf32>
    %52 = arith.addf %50, %51 : vector<1x128xf32>
    %53 = vector.broadcast %13 : f32 to vector<1x128xf32>
    %54 = arith.mulf %53, %52 : vector<1x128xf32>
    %55 = arith.mulf %54, %54 : vector<1x128xf32>
    %56 = arith.addf %42, %55 : vector<1x128xf32>
    %57 = vector.broadcast %2 : f32 to vector<1x128xf32>
    %58 = arith.mulf %57, %18 : vector<1x128xf32>
    %59 = vector.broadcast %5 : f32 to vector<1x128xf32>
    %60 = arith.mulf %59, %19 : vector<1x128xf32>
    %61 = arith.addf %58, %60 : vector<1x128xf32>
    %62 = vector.broadcast %8 : f32 to vector<1x128xf32>
    %63 = arith.mulf %62, %20 : vector<1x128xf32>
    %64 = arith.addf %61, %63 : vector<1x128xf32>
    %65 = vector.broadcast %11 : f32 to vector<1x128xf32>
    %66 = arith.addf %64, %65 : vector<1x128xf32>
    %67 = vector.broadcast %14 : f32 to vector<1x128xf32>
    %68 = arith.mulf %67, %66 : vector<1x128xf32>
    %69 = arith.mulf %68, %68 : vector<1x128xf32>
    %70 = arith.addf %56, %69 : vector<1x128xf32>
    %71 = math.sqrt %70 : vector<1x128xf32>
    %72 = vector.broadcast %0 : f32 to vector<1x128xf32>
    %73 = arith.mulf %72, %21 : vector<1x128xf32>
    %74 = vector.broadcast %3 : f32 to vector<1x128xf32>
    %75 = arith.mulf %74, %24 : vector<1x128xf32>
    %76 = arith.addf %73, %75 : vector<1x128xf32>
    %77 = vector.broadcast %6 : f32 to vector<1x128xf32>
    %78 = arith.mulf %77, %27 : vector<1x128xf32>
    %79 = arith.addf %76, %78 : vector<1x128xf32>
    %cst = arith.constant 1.000000e+00 : f32
    %80 = vector.broadcast %cst : f32 to vector<1x128xf32>
    %81 = arith.subf %80, %79 : vector<1x128xf32>
    %82 = arith.mulf %81, %81 : vector<1x128xf32>
    %83 = vector.broadcast %0 : f32 to vector<1x128xf32>
    %84 = arith.mulf %83, %22 : vector<1x128xf32>
    %85 = vector.broadcast %3 : f32 to vector<1x128xf32>
    %86 = arith.mulf %85, %25 : vector<1x128xf32>
    %87 = arith.addf %84, %86 : vector<1x128xf32>
    %88 = vector.broadcast %6 : f32 to vector<1x128xf32>
    %89 = arith.mulf %88, %28 : vector<1x128xf32>
    %90 = arith.addf %87, %89 : vector<1x128xf32>
    %cst_24 = arith.constant 0.000000e+00 : f32
    %91 = vector.broadcast %cst_24 : f32 to vector<1x128xf32>
    %92 = arith.subf %91, %90 : vector<1x128xf32>
    %93 = arith.mulf %92, %92 : vector<1x128xf32>
    %94 = arith.addf %82, %93 : vector<1x128xf32>
    %95 = vector.broadcast %0 : f32 to vector<1x128xf32>
    %96 = arith.mulf %95, %23 : vector<1x128xf32>
    %97 = vector.broadcast %3 : f32 to vector<1x128xf32>
    %98 = arith.mulf %97, %26 : vector<1x128xf32>
    %99 = arith.addf %96, %98 : vector<1x128xf32>
    %100 = vector.broadcast %6 : f32 to vector<1x128xf32>
    %101 = arith.mulf %100, %29 : vector<1x128xf32>
    %102 = arith.addf %99, %101 : vector<1x128xf32>
    %cst_25 = arith.constant 0.000000e+00 : f32
    %103 = vector.broadcast %cst_25 : f32 to vector<1x128xf32>
    %104 = arith.subf %103, %102 : vector<1x128xf32>
    %105 = arith.mulf %104, %104 : vector<1x128xf32>
    %106 = arith.addf %94, %105 : vector<1x128xf32>
    %107 = math.sqrt %106 : vector<1x128xf32>
    %108 = vector.broadcast %15 : f32 to vector<1x128xf32>
    %109 = arith.mulf %108, %107 : vector<1x128xf32>
    %110 = vector.broadcast %1 : f32 to vector<1x128xf32>
    %111 = arith.mulf %110, %21 : vector<1x128xf32>
    %112 = vector.broadcast %4 : f32 to vector<1x128xf32>
    %113 = arith.mulf %112, %24 : vector<1x128xf32>
    %114 = arith.addf %111, %113 : vector<1x128xf32>
    %115 = vector.broadcast %7 : f32 to vector<1x128xf32>
    %116 = arith.mulf %115, %27 : vector<1x128xf32>
    %117 = arith.addf %114, %116 : vector<1x128xf32>
    %cst_26 = arith.constant 0.000000e+00 : f32
    %118 = vector.broadcast %cst_26 : f32 to vector<1x128xf32>
    %119 = arith.subf %118, %117 : vector<1x128xf32>
    %120 = arith.mulf %119, %119 : vector<1x128xf32>
    %121 = vector.broadcast %1 : f32 to vector<1x128xf32>
    %122 = arith.mulf %121, %22 : vector<1x128xf32>
    %123 = vector.broadcast %4 : f32 to vector<1x128xf32>
    %124 = arith.mulf %123, %25 : vector<1x128xf32>
    %125 = arith.addf %122, %124 : vector<1x128xf32>
    %126 = vector.broadcast %7 : f32 to vector<1x128xf32>
    %127 = arith.mulf %126, %28 : vector<1x128xf32>
    %128 = arith.addf %125, %127 : vector<1x128xf32>
    %cst_27 = arith.constant 1.000000e+00 : f32
    %129 = vector.broadcast %cst_27 : f32 to vector<1x128xf32>
    %130 = arith.subf %129, %128 : vector<1x128xf32>
    %131 = arith.mulf %130, %130 : vector<1x128xf32>
    %132 = arith.addf %120, %131 : vector<1x128xf32>
    %133 = vector.broadcast %1 : f32 to vector<1x128xf32>
    %134 = arith.mulf %133, %23 : vector<1x128xf32>
    %135 = vector.broadcast %4 : f32 to vector<1x128xf32>
    %136 = arith.mulf %135, %26 : vector<1x128xf32>
    %137 = arith.addf %134, %136 : vector<1x128xf32>
    %138 = vector.broadcast %7 : f32 to vector<1x128xf32>
    %139 = arith.mulf %138, %29 : vector<1x128xf32>
    %140 = arith.addf %137, %139 : vector<1x128xf32>
    %cst_28 = arith.constant 0.000000e+00 : f32
    %141 = vector.broadcast %cst_28 : f32 to vector<1x128xf32>
    %142 = arith.subf %141, %140 : vector<1x128xf32>
    %143 = arith.mulf %142, %142 : vector<1x128xf32>
    %144 = arith.addf %132, %143 : vector<1x128xf32>
    %145 = math.sqrt %144 : vector<1x128xf32>
    %146 = vector.broadcast %16 : f32 to vector<1x128xf32>
    %147 = arith.mulf %146, %145 : vector<1x128xf32>
    %148 = arith.addf %109, %147 : vector<1x128xf32>
    %149 = vector.broadcast %2 : f32 to vector<1x128xf32>
    %150 = arith.mulf %149, %21 : vector<1x128xf32>
    %151 = vector.broadcast %5 : f32 to vector<1x128xf32>
    %152 = arith.mulf %151, %24 : vector<1x128xf32>
    %153 = arith.addf %150, %152 : vector<1x128xf32>
    %154 = vector.broadcast %8 : f32 to vector<1x128xf32>
    %155 = arith.mulf %154, %27 : vector<1x128xf32>
    %156 = arith.addf %153, %155 : vector<1x128xf32>
    %cst_29 = arith.constant 0.000000e+00 : f32
    %157 = vector.broadcast %cst_29 : f32 to vector<1x128xf32>
    %158 = arith.subf %157, %156 : vector<1x128xf32>
    %159 = arith.mulf %158, %158 : vector<1x128xf32>
    %160 = vector.broadcast %2 : f32 to vector<1x128xf32>
    %161 = arith.mulf %160, %22 : vector<1x128xf32>
    %162 = vector.broadcast %5 : f32 to vector<1x128xf32>
    %163 = arith.mulf %162, %25 : vector<1x128xf32>
    %164 = arith.addf %161, %163 : vector<1x128xf32>
    %165 = vector.broadcast %8 : f32 to vector<1x128xf32>
    %166 = arith.mulf %165, %28 : vector<1x128xf32>
    %167 = arith.addf %164, %166 : vector<1x128xf32>
    %cst_30 = arith.constant 0.000000e+00 : f32
    %168 = vector.broadcast %cst_30 : f32 to vector<1x128xf32>
    %169 = arith.subf %168, %167 : vector<1x128xf32>
    %170 = arith.mulf %169, %169 : vector<1x128xf32>
    %171 = arith.addf %159, %170 : vector<1x128xf32>
    %172 = vector.broadcast %2 : f32 to vector<1x128xf32>
    %173 = arith.mulf %172, %23 : vector<1x128xf32>
    %174 = vector.broadcast %5 : f32 to vector<1x128xf32>
    %175 = arith.mulf %174, %26 : vector<1x128xf32>
    %176 = arith.addf %173, %175 : vector<1x128xf32>
    %177 = vector.broadcast %8 : f32 to vector<1x128xf32>
    %178 = arith.mulf %177, %29 : vector<1x128xf32>
    %179 = arith.addf %176, %178 : vector<1x128xf32>
    %cst_31 = arith.constant 1.000000e+00 : f32
    %180 = vector.broadcast %cst_31 : f32 to vector<1x128xf32>
    %181 = arith.subf %180, %179 : vector<1x128xf32>
    %182 = arith.mulf %181, %181 : vector<1x128xf32>
    %183 = arith.addf %171, %182 : vector<1x128xf32>
    %184 = math.sqrt %183 : vector<1x128xf32>
    %185 = vector.broadcast %17 : f32 to vector<1x128xf32>
    %186 = arith.mulf %185, %184 : vector<1x128xf32>
    %187 = arith.addf %148, %186 : vector<1x128xf32>
    %188 = arith.mulf %187, %187 : vector<1x128xf32>
    %cst_32 = arith.constant 0.000000e+00 : f32
    %189 = vector.broadcast %cst_32 : f32 to vector<1x128xf32>
    %cst_33 = arith.constant 1.000000e+02 : f32
    %190 = vector.broadcast %cst_33 : f32 to vector<1x128xf32>
    %191 = arith.cmpf ole, %71, %190 : vector<1x128xf32>
    %192 = arith.select %191, %188, %189 : vector<1x128xi1>, vector<1x128xf32>
    %cst_34 = arith.constant 0.000000e+00 : f32
    %193 = vector.broadcast %cst_34 : f32 to vector<1x128xf32>
    %194 = arith.cmpf oge, %192, %193 : vector<1x128xf32>
    %195 = arith.andi %191, %194 : vector<1x128xi1>
    %196 = math.absf %187 : vector<1x128xf32>
    %197 = arith.select %195, %196, %189 : vector<1x128xi1>, vector<1x128xf32>
    %cst_35 = arith.constant 0.000000e+00 : f32
    %198 = vector.broadcast %cst_35 : f32 to vector<1x128xf32>
    %199 = arith.cmpf oge, %70, %198 : vector<1x128xf32>
    %200 = arith.select %199, %71, %189 : vector<1x128xi1>, vector<1x128xf32>
    %cst_36 = arith.constant 1.000000e+00 : f32
    %201 = vector.broadcast %cst_36 : f32 to vector<1x128xf32>
    %202 = arith.mulf %201, %197 : vector<1x128xf32>
    %cst_37 = arith.constant 1.000000e+01 : f32
    %203 = vector.broadcast %cst_37 : f32 to vector<1x128xf32>
    %204 = arith.mulf %203, %200 : vector<1x128xf32>
    %205 = arith.addf %202, %204 : vector<1x128xf32>
    %c0_38 = arith.constant 0 : index
    %c0_39 = arith.constant 0 : index
    %206 = vector.load %arg4[%c0_38, %c0_39] : memref<3x128xf32, #tpu.memory_space<vmem>>, vector<1x128xf32>
    tpu.vector_store %arg4[%c0_38, %c0_39], %205 {strides = array<i32>} : memref<3x128xf32, #tpu.memory_space<vmem>>, vector<1x128xf32>,
    %c1_40 = arith.constant 1 : index
    %c0_41 = arith.constant 0 : index
    %207 = vector.load %arg4[%c1_40, %c0_41] : memref<3x128xf32, #tpu.memory_space<vmem>>, vector<1x128xf32>
    tpu.vector_store %arg4[%c1_40, %c0_41], %71 {strides = array<i32>} : memref<3x128xf32, #tpu.memory_space<vmem>>, vector<1x128xf32>,
    %c2_42 = arith.constant 2 : index
    %c0_43 = arith.constant 0 : index
    %208 = vector.load %arg4[%c2_42, %c0_43] : memref<3x128xf32, #tpu.memory_space<vmem>>, vector<1x128xf32>
    tpu.vector_store %arg4[%c2_42, %c0_43], %188 {strides = array<i32>} : memref<3x128xf32, #tpu.memory_space<vmem>>, vector<1x128xf32>,
    return
  }
  func.func @transform_0(%arg0: i32) -> i32 {
    %c0_i32 = arith.constant 0 : i32
    %c0_i32_0 = arith.constant 0 : i32
    return %c0_i32 : i32
  }
  func.func @transform_1(%arg0: i32) -> (i32, i32) {
    %c0_i32 = arith.constant 0 : i32
    %c0_i32_0 = arith.constant 0 : i32
    return %c0_i32, %arg0 : i32, i32
  }
  func.func @transform_2(%arg0: i32) -> (i32, i32) {
    %c0_i32 = arith.constant 0 : i32
    %c0_i32_0 = arith.constant 0 : i32
    return %c0_i32, %arg0 : i32, i32
  }
  func.func @transform_3(%arg0: i32) -> (i32, i32) {
    %c0_i32 = arith.constant 0 : i32
    %c0_i32_0 = arith.constant 0 : i32
    return %c0_i32, %arg0 : i32, i32
  }
}

</mosaic_0001>

<bundles_post_ra>
// kernel: tpu_custom_call.1
= control target key start
LH: loop header
LB: loop body
LE: loop exit
PB: predicated region body
PF: predicated region fallthrough
CT: control target
= control target key end

     0   :  { %8 = vsyncpa [#allocation5], 0  ;;  %s569_s0 = inlined_call_operand.hbm [shape: f32[18], index: 0, kind: input, shape index: {}]   ;;  %s570_s1 = inlined_call_operand.hbm [shape: f32[3,128], index: 1, kind: input, shape index: {}]   ;;  %s571_s2 = inlined_call_operand.hbm [shape: f32[9,128], index: 2, kind: input, shape index: {}]   ;;  %s572_s3 = inlined_call_operand.hbm [shape: f32[3,128], index: 3, kind: output, shape index: {}]  }
   0x1   :  { %9 = vsyncpa [#allocation3], 0 }
   0x2   :  { %10 = vsyncpa [#allocation8], 0 }
   0x3   :  { %11 = vsyncpa [#allocation4], 0  ;;  %s17_s14 = sshll.u32 %s569_s0, 4  ;;  %s26_s17 = sshll.u32 %s570_s1, 4  ;;  %s18_s14 = int_to_ptr.hbm [resolvable:$true] %s17_s14  ;;  %s27_s17 = int_to_ptr.hbm [resolvable:$true] %s26_s17 }
   0x4   :  { %s410_s18 = smov [#allocation2]   ;;  %s411_s19 = smov [#allocation6]  }
   0x5   :  { %20 = dma.hbm_to_smem %s18_s14, 16, %s410_s18, [#allocation5]  }
   0x6   :  { %s28_s20 = sshll.u32 %s411_s19, 4  ;;  %s36_s23 = sshll.u32 %s571_s2, 4  ;;  %s29_s20 = int_to_ptr.vmem [resolvable:$true] %s28_s20  ;;  %s37_s23 = int_to_ptr.hbm [resolvable:$true] %s36_s23 }
   0x7   :  { %31 = dma.hbm_to_vmem [thread:$0]  %s27_s17, 64, %s29_s20, [#allocation3]  }
   0x8   :  { %s412_s24 = smov [#allocation7]   ;;  %s413_s0 = smov 128  }
   0x9   :  { %s38_s25 = sshll.u32 %s412_s24, 4  ;;  %s414_s26 = smov 8   ;;  %s39_s25 = int_to_ptr.vmem [resolvable:$true] %s38_s25 }
   0xa   :  { %44 = dma.hbm_to_vmem [thread:$0]  %s37_s23, 256, %s39_s25, [#allocation8], %s413_s0, %s413_s0, %s414_s26  }
   0xb   :  { %402 = dma.done.wait [#allocation5], 16  }
   0xc   :  { %403 = vsyncadd [#allocation5], 4294967280 }
   0xd   :  { %404 = dma.done.wait [#allocation3], 64  }
   0xe   :  { %405 = vsyncadd [#allocation3], 4294967232 }
   0xf   :  { %406 = dma.done.wait [#allocation8], 256  }
  0x10   :  { %407 = vsyncadd [#allocation8], 4294967040 }
  0x11   :  { %57 = sfence }
  0x12   :  { %s58_s1 = sld [smem:[#allocation2]]  ;;  %v76_v0 = vld [vmem:[#allocation6] sm:$0x1]  ;;  %v445_v1 = vld [vmem:[#allocation7] sm:$0x1]  ;;  %s415_s16 = smov [#allocation9]  }
  0x13   :  { %s287_s27 = sld [smem:[#allocation2 + $0x1]]  ;;  %v449_v2 = vld [vmem:[#allocation7 + $0x1] sm:$0x1]  ;;  %v451_v3 = vld [vmem:[#allocation7 + $0x2] sm:$0x1]  ;;  %s273_s17 = sshll.u32 %s415_s16, 4  ;;  %s274_s17 = int_to_ptr.vmem [resolvable:$true] %s273_s17 }
  0x14   :  { %s288_s28 = sld [smem:[#allocation2 + $0x2]]  ;;  %v77_v4 = vld [vmem:[#allocation6 + $0x1] sm:$0x1]  ;;  %v457_v6 = vld [vmem:[#allocation7 + $0x3] sm:$0x1]  ;;  %s275_s20 = sshll.u32 %s572_s3, 4  ;;  %s276_s20 = int_to_ptr.hbm [resolvable:$true] %s275_s20 }
  0x15   :  { %s289_s2 = sld [smem:[#allocation2 + $0x3]]  ;;  %v459_v7 = vld [vmem:[#allocation7 + $0x4] sm:$0x1]  ;;  %v466_v11 = vld [vmem:[#allocation7 + $0x5] sm:$0x1] }
  0x16   :  { %s290_s29 = sld [smem:[#allocation2 + $0x4]]  ;;  %v78_v20 = vld [vmem:[#allocation6 + $0x2] sm:$0x1]  ;;  %v484_v21 = vld [vmem:[#allocation7 + $0x6] sm:$0x1] }
  0x17   :  { %s447_s30 = sld [smem:[#allocation2 + $0x5]]  ;;  %v501_v34 = vld [vmem:[#allocation7 + $0x7] sm:$0x1]  ;;  %v510_v43 = vld [vmem:[#allocation7 + $0x8] sm:$0x1] }
  0x18   :  { %s453_s4 = sld [smem:[#allocation2 + $0x6]]  ;;  %v88_v5 = vstv %s58_s1 }
  0x19   :  { %s455_s5 = sld [smem:[#allocation2 + $0x7]]  ;;  %v89_v8 = vmul.f32 %v88_v5, %v76_v0  ;;  %v461_v9 = vstv %s287_s27  ;;  %v141_v10 = vmul.f32 %v88_v5, %v445_v1  ;;  %v148_v14 = vmul.f32 %v88_v5, %v449_v2 }
  0x1a   :  { %s464_s6 = sld [smem:[#allocation2 + $0x8]]  ;;  %v102_v12 = vmul.f32 %v461_v9, %v76_v0  ;;  %v469_v13 = vstv %s288_s28  ;;  %v156_v15 = vmul.f32 %v88_v5, %v451_v3  ;;  %v178_v18 = vmul.f32 %v461_v9, %v445_v1 }
  0x1b   :  { %s473_s7 = sld [smem:[#allocation2 + $0x9]]  ;;  %v90_v16 = vstv %s289_s2  ;;  %v116_v17 = vmul.f32 %v469_v13, %v76_v0  ;;  %v480_v19 = vmul.f32 %v461_v9, %v449_v2 }
  0x1c   :  { %s482_s8 = sld [smem:[#allocation2 + $0xa]]  ;;  %v91_v22 = vmul.f32 %v90_v16, %v77_v4  ;;  %v103_v23 = vstv %s290_s29  ;;  %v142_v24 = vmul.f32 %v90_v16, %v457_v6  ;;  %v149_v25 = vmul.f32 %v90_v16, %v459_v7 }
  0x1d   :  { %s488_s9 = sld [smem:[#allocation2 + $0xb]]  ;;  %v104_v26 = vmul.f32 %v103_v23, %v77_v4  ;;  %v491_v27 = vstv %s447_s30  ;;  %v157_v28 = vmul.f32 %v90_v16, %v466_v11  ;;  %v179_v29 = vmul.f32 %v103_v23, %v457_v6 }
  0x1e   :  { %s495_s10 = sld [smem:[#allocation2 + $0xc]]  ;;  %v92_v30 = vadd.f32 %v91_v22, %v89_v8  ;;  %v93_v31 = vstv %s453_s4  ;;  %v118_v32 = vmul.f32 %v491_v27, %v77_v4  ;;  %v143_v33 = vadd.f32 %v142_v24, %v141_v10 }
  0x1f   :  { %s499_s11 = sld [smem:[#allocation2 + $0xd]]  ;;  %v94_v35 = vmul.f32 %v93_v31, %v78_v20  ;;  %v105_v36 = vadd.f32 %v104_v26, %v102_v12  ;;  %v106_v37 = vstv %s455_s5  ;;  %v144_v38 = vmul.f32 %v93_v31, %v484_v21 }
  0x20   :  { %s505_s12 = sld [smem:[#allocation2 + $0xe]]  ;;  %v107_v39 = vmul.f32 %v106_v37, %v78_v20  ;;  %v119_v40 = vadd.f32 %v118_v32, %v116_v17  ;;  %v508_v41 = vstv %s464_s6  ;;  %v150_v42 = vadd.f32 %v149_v25, %v148_v14 }
  0x21   :  { %v95_v44 = vadd.f32 %v94_v35, %v92_v30  ;;  %v96_v45 = vstv %s473_s7  ;;  %v121_v46 = vmul.f32 %v508_v41, %v78_v20  ;;  %v145_v47 = vadd.f32 %v144_v38, %v143_v33  ;;  %s301_s13 = sld [smem:[#allocation2 + $0xf]] }
  0x22   :  { %v108_v48 = vadd.f32 %v107_v39, %v105_v36  ;;  %v109_v49 = vstv %s482_s8  ;;  %v151_v50 = vmul.f32 %v93_v31, %v501_v34  ;;  %v158_v51 = vadd.f32 %v157_v28, %v156_v15  ;;  %s302_s14 = sld [smem:[#allocation2 + $0x10]] }
  0x23   :  { %v97_v52 = vadd.f32 %v96_v45, %v95_v44  ;;  %v122_v53 = vadd.f32 %v121_v46, %v119_v40  ;;  %v123_v54 = vstv %s488_s9  ;;  %v146_v55 = vsub.f32 1.0, %v145_v47  ;;  %s303_s15 = sld [smem:[#allocation2 + $0x11]] }
  0x24   :  { %v98_v56 = vstv %s495_s10  ;;  %v110_v57 = vadd.f32 %v109_v49, %v108_v48  ;;  %v152_v58 = vadd.f32 %v151_v50, %v150_v42  ;;  %v159_v59 = vmul.f32 %v93_v31, %v510_v43 }
  0x25   :  { %v99_v60 = vmul.f32 %v98_v56, %v97_v52  ;;  %v111_v61 = vstv %s499_s11  ;;  %v124_v62 = vadd.f32 %v123_v54, %v122_v53  ;;  %v147_v63 = vmul.f32 %v146_v55, %v146_v55 }
  0x26   :  { %v112_v0 = vmul.f32 %v111_v61, %v110_v57  ;;  %v125_v4 = vstv %s505_s12  ;;  %v153_v5 = vsub.f32 0.0, %v152_v58  ;;  %v160_v8 = vadd.f32 %v159_v59, %v158_v51 }
  0x27   :  { %v100_v10 = vmul.f32 %v99_v60, %v99_v60  ;;  %v126_v12 = vmul.f32 %v125_v4, %v124_v62  ;;  %v180_v14 = vadd.f32 %v179_v29, %v178_v18  ;;  %v193_v15 = vmul.f32 %v461_v9, %v451_v3 }
  0x28   :  { %v113_v16 = vmul.f32 %v112_v0, %v112_v0  ;;  %v154_v17 = vmul.f32 %v153_v5, %v153_v5  ;;  %v161_v20 = vsub.f32 0.0, %v160_v8  ;;  %v181_v22 = vmul.f32 %v106_v37, %v484_v21 }
  0x29   :  { %v127_v24 = vmul.f32 %v126_v12, %v126_v12  ;;  %v186_v25 = vmul.f32 %v103_v23, %v459_v7  ;;  %v188_v26 = vmul.f32 %v106_v37, %v501_v34  ;;  %v194_v28 = vmul.f32 %v103_v23, %v466_v11 }
  0x2a   :  { %v114_v30 = vadd.f32 %v113_v16, %v100_v10  ;;  %v155_v31 = vadd.f32 %v154_v17, %v147_v63  ;;  %v162_v32 = vmul.f32 %v161_v20, %v161_v20  ;;  %v182_v33 = vadd.f32 %v181_v22, %v180_v14 }
  0x2b   :  { %v187_v18 = vadd.f32 %v186_v25, %v480_v19  ;;  %v195_v29 = vadd.f32 %v194_v28, %v193_v15  ;;  %v196_v9 = vmul.f32 %v106_v37, %v510_v43  ;;  %v216_v39 = vmul.f32 %v469_v13, %v445_v1 }
  0x2c   :  { %v529_v35 = vadd.f32 %v127_v24, %v114_v30  ;;  %v531_v36 = vadd.f32 %v162_v32, %v155_v31  ;;  %v183_v38 = vsub.f32 0.0, %v182_v33  ;;  %v217_v23 = vmul.f32 %v491_v27, %v457_v6 }
  0x2d   :  { %v189_v40 = vadd.f32 %v188_v26, %v187_v18  ;;  %v197_v42 = vadd.f32 %v196_v9, %v195_v29  ;;  %v219_v19 = vmul.f32 %v508_v41, %v484_v21  ;;  %v223_v47 = vmul.f32 %v469_v13, %v449_v2 }
  0x2e   :  { %310 = vrsqrt.f32 %v529_v35  ;;  %v184_v37 = vmul.f32 %v183_v38, %v183_v38  ;;  %v218_v46 = vadd.f32 %v217_v23, %v216_v39  ;;  %v224_v1 = vmul.f32 %v491_v27, %v459_v7 }
  0x2f   :  { %312 = vrsqrt.f32 %v531_v36  ;;  %v190_v44 = vsub.f32 1.0, %v189_v40  ;;  %v198_v45 = vsub.f32 0.0, %v197_v42  ;;  %v226_v6 = vmul.f32 %v508_v41, %v501_v34 }
  0x30   :  { %v231_v48 = vmul.f32 %v469_v13, %v451_v3  ;;  %v220_v50 = vadd.f32 %v219_v19, %v218_v46  ;;  %v232_v51 = vmul.f32 %v491_v27, %v466_v11  ;;  %v225_v52 = vadd.f32 %v224_v1, %v223_v47 }
  0x31   :  { %v191_v49 = vmul.f32 %v190_v44, %v190_v44  ;;  %v199_v21 = vmul.f32 %v198_v45, %v198_v45  ;;  %v234_v53 = vmul.f32 %v508_v41, %v510_v43  ;;  %vm136_vm0 = vcmp.eq.f32.partialorder %v529_v35, inf }
  0x32   :  { %v221_v55 = vsub.f32 0.0, %v220_v50  ;;  %v233_v7 = vadd.f32 %v232_v51, %v231_v48  ;;  %v227_v57 = vadd.f32 %v226_v6, %v225_v52  ;;  %v139_v14 = vand.u32 2147483648, %v529_v35 }
  0x33   :  { %v192_v54 = vadd.f32 %v191_v49, %v184_v37  ;;  %vm138_vm1 = vcmp.eq.f32.partialorder %v529_v35, 0.0  ;;  %vm171_vm2 = vcmp.eq.f32.partialorder %v531_v36, inf  ;;  %vm173_vm3 = vcmp.eq.f32.partialorder %v531_v36, 0.0 }
  0x34   :  { %v311_v2 = vpop.eup %310  ;;  %v235_v58 = vadd.f32 %v234_v53, %v233_v7  ;;  %v222_v60 = vmul.f32 %v221_v55, %v221_v55  ;;  %v228_v61 = vsub.f32 0.0, %v227_v57  ;;  %v174_v32 = vand.u32 2147483648, %v531_v36 }
  0x35   :  { %v313_v56 = vpop.eup %312  ;;  %v130_v34 = vmul.f32 %v311_v2, %v529_v35  ;;  %v200_v13 = vadd.f32 %v199_v21, %v192_v54  ;;  %v176_v42 = vstv %s301_s13  ;;  %v213_v19 = vstv %s302_s14 }
  0x36   :  { %v165_v3 = vmul.f32 %v313_v56, %v531_v36  ;;  %v229_v62 = vmul.f32 %v228_v61, %v228_v61  ;;  %v236_v41 = vsub.f32 1.0, %v235_v58  ;;  %vm261_vm8 = vcmp.ge.f32.partialorder %v529_v35, 0.0 }
  0x37   :  { %v131_v59 = vmul.f32 %v311_v2, %v130_v34  ;;  %314 = vrsqrt.f32 %v200_v13  ;;  %vm208_vm4 = vcmp.eq.f32.partialorder %v200_v13, inf  ;;  %v211_v29 = vand.u32 2147483648, %v200_v13 }
  0x38   :  { %v166_v11 = vmul.f32 %v313_v56, %v165_v3  ;;  %v230_v0 = vadd.f32 %v229_v62, %v222_v60  ;;  %v237_v4 = vmul.f32 %v236_v41, %v236_v41  ;;  %vm210_vm5 = vcmp.eq.f32.partialorder %v200_v13, 0.0 }
  0x39   :  { %v132_v27 = vmul.f32 0.5, %v131_v59 }
  0x3a   :  { %v167_v43 = vmul.f32 0.5, %v166_v11  ;;  %v238_v10 = vadd.f32 %v237_v4, %v230_v0 }
  0x3b   :  { %v133_v63 = vsub.f32 1.5, %v132_v27 }
  0x3c   :  { %v168_v5 = vsub.f32 1.5, %v167_v43  ;;  %316 = vrsqrt.f32 %v238_v10  ;;  %vm246_vm6 = vcmp.eq.f32.partialorder %v238_v10, inf  ;;  %v249_v1 = vand.u32 2147483648, %v238_v10 }
  0x3d   :  { %v134_v8 = vmul.f32 %v311_v2, %v133_v63  ;;  %v315_v12 = vpop.eup %314  ;;  %vm248_vm7 = vcmp.eq.f32.partialorder %v238_v10, 0.0 }
  0x3e   :  { %v202_v16 = vmul.f32 %v315_v12, %v200_v13  ;;  %v169_v17 = vmul.f32 %v313_v56, %v168_v5 }
  0x3f   :  { %v135_v15 = vmul.f32 %v134_v8, %v529_v35 }
  0x40   :  { %v203_v22 = vmul.f32 %v315_v12, %v202_v16  ;;  %v170_v26 = vmul.f32 %v169_v17, %v531_v36 }
  0x41   :  { %v137_v20 = vsel %vm136_vm0, %v529_v35, %v135_v15 }
  0x42   :  { %v140_v24 = vsel %vm138_vm1, %v139_v14, %v137_v20  ;;  %v204_v25 = vmul.f32 0.5, %v203_v22  ;;  %v317_v28 = vpop.eup %316  ;;  %v172_v18 = vsel %vm171_vm2, %v531_v36, %v170_v26  ;;  %v251_v36 = vstv %s303_s15 }
  0x43   :  { %266 = vst [vmem:[#allocation9 + $0x1] sm:$0x1] %v140_v24  ;;  %v240_v31 = vmul.f32 %v317_v28, %v238_v10  ;;  %v175_v40 = vsel %vm173_vm3, %v174_v32, %v172_v18  ;;  %vm255_vm9 = vcmp.le.f32.partialorder %v140_v24, 100.0  ;;  %v262_v52 = vsel %vm261_vm8, %v140_v24, 0.0 }
  0x44   :  { %v205_v30 = vsub.f32 1.5, %v204_v25  ;;  %v177_v45 = vmul.f32 %v176_v42, %v175_v40  ;;  %v263_v55 = vmul.f32 10.0, %v262_v52 }
  0x45   :  { %v241_v9 = vmul.f32 %v317_v28, %v240_v31 }
  0x46   :  { %v206_v33 = vmul.f32 %v315_v12, %v205_v30 }
  0x47   :  { %v242_v39 = vmul.f32 0.5, %v241_v9 }
  0x48   :  { %v207_v38 = vmul.f32 %v206_v33, %v200_v13 }
  0x49   :  { %v243_v44 = vsub.f32 1.5, %v242_v39 }
  0x4a   :  { %v209_v23 = vsel %vm208_vm4, %v200_v13, %v207_v38 }
  0x4b   :  { %v212_v37 = vsel %vm210_vm5, %v211_v29, %v209_v23  ;;  %v244_v47 = vmul.f32 %v317_v28, %v243_v44 }
  0x4c   :  { %v214_v46 = vmul.f32 %v213_v19, %v212_v37 }
  0x4d   :  { %v245_v6 = vmul.f32 %v244_v47, %v238_v10 }
  0x4e   :  { %v215_v48 = vadd.f32 %v214_v46, %v177_v45 }
  0x4f   :  { %v247_v49 = vsel %vm246_vm6, %v238_v10, %v245_v6 }
  0x50   :  { %v250_v21 = vsel %vm248_vm7, %v249_v1, %v247_v49 }
  0x51   :  { %v252_v50 = vmul.f32 %v251_v36, %v250_v21 }
  0x53   :  { %v253_v51 = vadd.f32 %v252_v50, %v215_v48 }
  0x55   :  { %v254_v53 = vmul.f32 %v253_v51, %v253_v51  ;;  %v259_v2 = vand.u32 2147483647, %v253_v51 }
  0x57   :  { %v256_v54 = vsel %vm255_vm9, %v254_v53, 0.0  ;;  %267 = vst [vmem:[#allocation9 + $0x2] sm:$0x1] %v254_v53 }
  0x58   :  { %vm257_vm10 = vcmp.ge.f32.partialorder %v256_v54, 0.0 }
  0x59   :  { %vm258_vm11 = vmand %vm255_vm9, %vm257_vm10 }
  0x5a   :  { %v260_v7 = vsel %vm258_vm11, %v259_v2, 0.0 }
  0x5b   :  { %v264_v56 = vadd.f32 %v263_v55, %v260_v7 }
  0x5d   :  { %265 = vst [vmem:[#allocation9] sm:$0x1] %v264_v56 }
  0x5e   :  { %278 = dma.vmem_to_hbm [thread:$0]  %s274_s17, 64, %s276_s20, [#allocation4]  }
  0x5f   :  { %408 = dma.done.wait [#allocation4], 64  }
  0x60   :  { %409 = vsyncadd [#allocation4], 4294967232 }
  0x61   :  { %283 = vsyncpa [#allocation3], 1 }
  0x62   :  { %284 = vsyncpa [#allocation8], 1 }
  0x63   :  { %285 = vsyncpa [#allocation4], 1 }
  0x64   :  { %286 = vsyncpa [#allocation5], 1 }

</bundles_post_ra>
